<compile_context>
chip_gen: v7x
topology: tpu7x:2x2x1
jax: 0.10.0
libtpu: 0.0.40
codegen_flags: <defaults>
</compile_context>

<pallas_src>
import jax
import jax.numpy as jnp
import numpy as np
from jax import lax
from jax.experimental import pallas as pl
from jax.experimental.pallas import tpu as pltpu

BN_EPS = 1e-5
K = 3  # conv kernel size (k=3, stride 1, pad 1)


def _make_frelu_kernel(N, H, W, cb):
    HW = H * W
    inv_n = 1.0 / float(N * HW)

    def kernel(x_ref, w_ref, g_ref, b_ref, m_ref, o_ref):
        # x_ref: (N, cb, HW) VMEM  -- channel group, channels on sublanes, spatial on lanes
        # w_ref: (9, cb, 1)  VMEM  -- per-tap per-channel weight columns
        # g_ref/b_ref: (1, cb, 1) VMEM -- BN gamma / beta for this channel group
        # m_ref: (9, HW)     VMEM  -- precomputed boundary-validity masks (resident)
        x = x_ref[...].astype(jnp.float32)                      # (N, cb, HW)

        # Depthwise 3x3 conv, stride 1, zero pad 1:
        # each tap = lane roll (XLU) + mul/add against a weight*mask plane.
        acc = jnp.zeros((N, cb, HW), jnp.float32)
        for di in range(K):
            for dj in range(K):
                oy, ox = di - 1, dj - 1
                t = di * K + dj
                shift = (-(oy * W + ox)) % HW                   # shifted[p] = x[p + oy*W + ox]
                xs = pltpu.roll(x, shift, axis=2) if shift else x
                # Fold the per-channel tap weight into the per-lane validity mask once
                # per channel group: (cb,1) * (1,HW) -> (cb,HW), amortized over N.
                wm = w_ref[t] * m_ref[t:t + 1, :]
                acc = acc + xs * wm[None, :, :]

        # BatchNorm2d training-mode forward: per-channel batch mean / biased variance
        # over (N, H, W), single pass, folded into one scale/shift.
        s1 = jnp.sum(acc, axis=0, keepdims=True)                # (1, cb, HW) -- sum over N
        s1 = jnp.sum(s1, axis=2, keepdims=True)                 # (1, cb, 1)  -- lane reduce
        s2 = jnp.sum(acc * acc, axis=0, keepdims=True)
        s2 = jnp.sum(s2, axis=2, keepdims=True)                 # (1, cb, 1)
        mean = s1 * inv_n
        var = jnp.maximum(s2 * inv_n - mean * mean, 0.0)        # clamp before rsqrt
        scale = lax.rsqrt(var + BN_EPS) * g_ref[...]            # (1, cb, 1)
        shift_v = b_ref[...] - mean * scale                     # (1, cb, 1)

        # FReLU: max(x, BN(conv(x)))
        o_ref[...] = jnp.maximum(x, acc * scale + shift_v).astype(o_ref.dtype)

    return kernel


def frelu(x, w, gamma, beta):
    """x: (N, C, H, W) f32; w: (C, K, K) f32 depthwise taps; gamma/beta: (C,) f32."""
    N, C, H, W = x.shape
    HW = H * W

    # Free views / tiny host-side precompute (would be done once per module in practice).
    x3 = x.reshape(N, C, HW)                                     # contiguous reshape, no copy
    w_taps = jnp.transpose(w.reshape(C, K * K), (1, 0))[:, :, None]   # (9, C, 1)
    g3 = gamma.reshape(1, C, 1)
    b3 = beta.reshape(1, C, 1)

    # Boundary-validity masks for the flattened spatial (lane) axis, one per tap.
    yy, xx = np.meshgrid(np.arange(H), np.arange(W), indexing="ij")
    yy = yy.reshape(-1)
    xx = xx.reshape(-1)
    masks_np = np.zeros((K * K, HW), np.float32)
    for di in range(K):
        for dj in range(K):
            oy, ox = di - 1, dj - 1
            valid = (yy + oy >= 0) & (yy + oy < H) & (xx + ox >= 0) & (xx + ox < W)
            masks_np[di * K + dj] = valid.astype(np.float32)
    masks = jnp.asarray(masks_np)                                # (9, HW)

    # Channels per grid step: fill sublanes from the channel axis when possible.
    cb = 8 if C % 8 == 0 else C
    grid = (C // cb,)

    kernel = _make_frelu_kernel(N, H, W, cb)

    out3 = pl.pallas_call(
        kernel,
        out_shape=jax.ShapeDtypeStruct((N, C, HW), x.dtype),
        grid=grid,
        in_specs=[
            pl.BlockSpec((N, cb, HW), lambda g: (0, g, 0)),      # x (channel group)
            pl.BlockSpec((K * K, cb, 1), lambda g: (0, g, 0)),   # per-tap weight columns
            pl.BlockSpec((1, cb, 1), lambda g: (0, g, 0)),       # gamma
            pl.BlockSpec((1, cb, 1), lambda g: (0, g, 0)),       # beta
            pl.BlockSpec((K * K, HW), lambda g: (0, 0)),         # masks (resident)
        ],
        out_specs=pl.BlockSpec((N, cb, HW), lambda g: (0, g, 0)),
        compiler_params=pltpu.CompilerParams(
            dimension_semantics=("parallel",)),
    )(x3, w_taps, g3, b3, masks)

    return out3.reshape(N, C, H, W)                              # free reshape back


def frelu_ref(x, w, gamma, beta):
    """Pure-JAX reference (depthwise conv + batch-stat BN + max)."""
    C = x.shape[1]
    conv = lax.conv_general_dilated(
        x, w.reshape(C, 1, K, K),
        window_strides=(1, 1), padding=((1, 1), (1, 1)),
        dimension_numbers=("NCHW", "OIHW", "NCHW"),
        feature_group_count=C)
    mean = conv.mean(axis=(0, 2, 3), keepdims=True)
    var = ((conv - mean) ** 2).mean(axis=(0, 2, 3), keepdims=True)
    bn = (conv - mean) * lax.rsqrt(var + BN_EPS) * gamma.reshape(1, C, 1, 1) \
         + beta.reshape(1, C, 1, 1)
    return jnp.maximum(x, bn)


if __name__ == "__main__":
    key = jax.random.PRNGKey(0)
    kx, kw, kg, kb = jax.random.split(key, 4)

    N, C, H, W = 2, 4, 16, 16
    x = jax.random.normal(kx, (N, C, H, W), dtype=jnp.float32)
    # Depthwise conv weight: Conv2d(c1, c1, 3, groups=c1, bias=False) -> (C, 1, 3, 3),
    # stored here as (C, 3, 3). Deterministic synthetic init.
    w = 0.1 * jax.random.normal(kw, (C, K, K), dtype=jnp.float32)
    # BatchNorm2d affine params (synthetic, deterministic).
    gamma = 1.0 + 0.1 * jax.random.normal(kg, (C,), dtype=jnp.float32)
    beta = 0.1 * jax.random.normal(kb, (C,), dtype=jnp.float32)

    out = jax.block_until_ready(frelu(x, w, gamma, beta))
    ref = jax.block_until_ready(frelu_ref(x, w, gamma, beta))

    if not jnp.allclose(out, ref, atol=1e-4, rtol=1e-4):
        raise AssertionError("Pallas FReLU does not match reference")
    print("KERNEL_OK")
</pallas_src>

<mosaic_0001>
module attributes {stable_mosaic.version = 11 : i64} {
  func.func @kernel(%arg0: i32, %arg1: memref<2x4x256xf32, #tpu.memory_space<vmem>>, %arg2: memref<9x4x1xf32, #tpu.memory_space<vmem>>, %arg3: memref<1x4x1xf32, #tpu.memory_space<vmem>>, %arg4: memref<1x4x1xf32, #tpu.memory_space<vmem>>, %arg5: memref<9x256xf32, #tpu.memory_space<vmem>>, %arg6: memref<2x4x256xf32, #tpu.memory_space<vmem>>) attributes {dimension_semantics = [#tpu.dimension_semantics<parallel>], iteration_bounds = array<i64: 1>, scalar_prefetch = 0 : i64, scratch_operands = 0 : i64, tpu.core_type = #tpu.core_type<tc>, window_params = [{transform_indices = @transform_0, window_bounds = array<i64: 2, 4, 256>}, {transform_indices = @transform_1, window_bounds = array<i64: 9, 4, 1>}, {transform_indices = @transform_2, window_bounds = array<i64: 1, 4, 1>}, {transform_indices = @transform_3, window_bounds = array<i64: 1, 4, 1>}, {pipeline_mode = #tpu.pipeline_mode<synchronous>, transform_indices = @transform_4, window_bounds = array<i64: 9, 256>}, {transform_indices = @transform_5, window_bounds = array<i64: 2, 4, 256>}]} {
    %c0 = arith.constant 0 : index
    %c0_0 = arith.constant 0 : index
    %c0_1 = arith.constant 0 : index
    %0 = vector.load %arg1[%c0, %c0_0, %c0_1] : memref<2x4x256xf32, #tpu.memory_space<vmem>>, vector<2x4x256xf32>
    %cst = arith.constant 0.000000e+00 : f32
    %1 = vector.broadcast %cst : f32 to vector<2x4x256xf32>
    %c17_i32 = arith.constant 17 : i32
    %2 = tpu.dynamic_rotate %0 by %c17_i32 dim 2 : vector<2x4x256xf32>, i32 -> vector<2x4x256xf32>
    %c0_2 = arith.constant 0 : index
    %c0_3 = arith.constant 0 : index
    %c0_4 = arith.constant 0 : index
    %3 = vector.load %arg2[%c0_2, %c0_3, %c0_4] : memref<9x4x1xf32, #tpu.memory_space<vmem>>, vector<1x4x1xf32>
    %4 = vector.shape_cast %3 : vector<1x4x1xf32> to vector<4x1xf32>
    %c0_5 = arith.constant 0 : index
    %c0_6 = arith.constant 0 : index
    %5 = vector.load %arg5[%c0_5, %c0_6] : memref<9x256xf32, #tpu.memory_space<vmem>>, vector<1x256xf32>
    %6 = vector.broadcast %4 : vector<4x1xf32> to vector<4x256xf32>
    %7 = vector.broadcast %5 : vector<1x256xf32> to vector<4x256xf32>
    %8 = arith.mulf %6, %7 : vector<4x256xf32>
    %9 = vector.shape_cast %8 : vector<4x256xf32> to vector<1x4x256xf32>
    %10 = vector.broadcast %9 : vector<1x4x256xf32> to vector<2x4x256xf32>
    %11 = arith.mulf %2, %10 : vector<2x4x256xf32>
    %12 = arith.addf %1, %11 : vector<2x4x256xf32>
    %c16_i32 = arith.constant 16 : i32
    %13 = tpu.dynamic_rotate %0 by %c16_i32 dim 2 : vector<2x4x256xf32>, i32 -> vector<2x4x256xf32>
    %c1 = arith.constant 1 : index
    %c0_7 = arith.constant 0 : index
    %c0_8 = arith.constant 0 : index
    %14 = vector.load %arg2[%c1, %c0_7, %c0_8] : memref<9x4x1xf32, #tpu.memory_space<vmem>>, vector<1x4x1xf32>
    %15 = vector.shape_cast %14 : vector<1x4x1xf32> to vector<4x1xf32>
    %c1_9 = arith.constant 1 : index
    %c0_10 = arith.constant 0 : index
    %16 = vector.load %arg5[%c1_9, %c0_10] : memref<9x256xf32, #tpu.memory_space<vmem>>, vector<1x256xf32>
    %17 = vector.broadcast %15 : vector<4x1xf32> to vector<4x256xf32>
    %18 = vector.broadcast %16 : vector<1x256xf32> to vector<4x256xf32>
    %19 = arith.mulf %17, %18 : vector<4x256xf32>
    %20 = vector.shape_cast %19 : vector<4x256xf32> to vector<1x4x256xf32>
    %21 = vector.broadcast %20 : vector<1x4x256xf32> to vector<2x4x256xf32>
    %22 = arith.mulf %13, %21 : vector<2x4x256xf32>
    %23 = arith.addf %12, %22 : vector<2x4x256xf32>
    %c15_i32 = arith.constant 15 : i32
    %24 = tpu.dynamic_rotate %0 by %c15_i32 dim 2 : vector<2x4x256xf32>, i32 -> vector<2x4x256xf32>
    %c2 = arith.constant 2 : index
    %c0_11 = arith.constant 0 : index
    %c0_12 = arith.constant 0 : index
    %25 = vector.load %arg2[%c2, %c0_11, %c0_12] : memref<9x4x1xf32, #tpu.memory_space<vmem>>, vector<1x4x1xf32>
    %26 = vector.shape_cast %25 : vector<1x4x1xf32> to vector<4x1xf32>
    %c2_13 = arith.constant 2 : index
    %c0_14 = arith.constant 0 : index
    %27 = vector.load %arg5[%c2_13, %c0_14] : memref<9x256xf32, #tpu.memory_space<vmem>>, vector<1x256xf32>
    %28 = vector.broadcast %26 : vector<4x1xf32> to vector<4x256xf32>
    %29 = vector.broadcast %27 : vector<1x256xf32> to vector<4x256xf32>
    %30 = arith.mulf %28, %29 : vector<4x256xf32>
    %31 = vector.shape_cast %30 : vector<4x256xf32> to vector<1x4x256xf32>
    %32 = vector.broadcast %31 : vector<1x4x256xf32> to vector<2x4x256xf32>
    %33 = arith.mulf %24, %32 : vector<2x4x256xf32>
    %34 = arith.addf %23, %33 : vector<2x4x256xf32>
    %c1_i32 = arith.constant 1 : i32
    %35 = tpu.dynamic_rotate %0 by %c1_i32 dim 2 : vector<2x4x256xf32>, i32 -> vector<2x4x256xf32>
    %c3 = arith.constant 3 : index
    %c0_15 = arith.constant 0 : index
    %c0_16 = arith.constant 0 : index
    %36 = vector.load %arg2[%c3, %c0_15, %c0_16] : memref<9x4x1xf32, #tpu.memory_space<vmem>>, vector<1x4x1xf32>
    %37 = vector.shape_cast %36 : vector<1x4x1xf32> to vector<4x1xf32>
    %c3_17 = arith.constant 3 : index
    %c0_18 = arith.constant 0 : index
    %38 = vector.load %arg5[%c3_17, %c0_18] : memref<9x256xf32, #tpu.memory_space<vmem>>, vector<1x256xf32>
    %39 = vector.broadcast %37 : vector<4x1xf32> to vector<4x256xf32>
    %40 = vector.broadcast %38 : vector<1x256xf32> to vector<4x256xf32>
    %41 = arith.mulf %39, %40 : vector<4x256xf32>
    %42 = vector.shape_cast %41 : vector<4x256xf32> to vector<1x4x256xf32>
    %43 = vector.broadcast %42 : vector<1x4x256xf32> to vector<2x4x256xf32>
    %44 = arith.mulf %35, %43 : vector<2x4x256xf32>
    %45 = arith.addf %34, %44 : vector<2x4x256xf32>
    %c4 = arith.constant 4 : index
    %c0_19 = arith.constant 0 : index
    %c0_20 = arith.constant 0 : index
    %46 = vector.load %arg2[%c4, %c0_19, %c0_20] : memref<9x4x1xf32, #tpu.memory_space<vmem>>, vector<1x4x1xf32>
    %47 = vector.shape_cast %46 : vector<1x4x1xf32> to vector<4x1xf32>
    %c4_21 = arith.constant 4 : index
    %c0_22 = arith.constant 0 : index
    %48 = vector.load %arg5[%c4_21, %c0_22] : memref<9x256xf32, #tpu.memory_space<vmem>>, vector<1x256xf32>
    %49 = vector.broadcast %47 : vector<4x1xf32> to vector<4x256xf32>
    %50 = vector.broadcast %48 : vector<1x256xf32> to vector<4x256xf32>
    %51 = arith.mulf %49, %50 : vector<4x256xf32>
    %52 = vector.shape_cast %51 : vector<4x256xf32> to vector<1x4x256xf32>
    %53 = vector.broadcast %52 : vector<1x4x256xf32> to vector<2x4x256xf32>
    %54 = arith.mulf %0, %53 : vector<2x4x256xf32>
    %55 = arith.addf %45, %54 : vector<2x4x256xf32>
    %c255_i32 = arith.constant 255 : i32
    %56 = tpu.dynamic_rotate %0 by %c255_i32 dim 2 : vector<2x4x256xf32>, i32 -> vector<2x4x256xf32>
    %c5 = arith.constant 5 : index
    %c0_23 = arith.constant 0 : index
    %c0_24 = arith.constant 0 : index
    %57 = vector.load %arg2[%c5, %c0_23, %c0_24] : memref<9x4x1xf32, #tpu.memory_space<vmem>>, vector<1x4x1xf32>
    %58 = vector.shape_cast %57 : vector<1x4x1xf32> to vector<4x1xf32>
    %c5_25 = arith.constant 5 : index
    %c0_26 = arith.constant 0 : index
    %59 = vector.load %arg5[%c5_25, %c0_26] : memref<9x256xf32, #tpu.memory_space<vmem>>, vector<1x256xf32>
    %60 = vector.broadcast %58 : vector<4x1xf32> to vector<4x256xf32>
    %61 = vector.broadcast %59 : vector<1x256xf32> to vector<4x256xf32>
    %62 = arith.mulf %60, %61 : vector<4x256xf32>
    %63 = vector.shape_cast %62 : vector<4x256xf32> to vector<1x4x256xf32>
    %64 = vector.broadcast %63 : vector<1x4x256xf32> to vector<2x4x256xf32>
    %65 = arith.mulf %56, %64 : vector<2x4x256xf32>
    %66 = arith.addf %55, %65 : vector<2x4x256xf32>
    %c241_i32 = arith.constant 241 : i32
    %67 = tpu.dynamic_rotate %0 by %c241_i32 dim 2 : vector<2x4x256xf32>, i32 -> vector<2x4x256xf32>
    %c6 = arith.constant 6 : index
    %c0_27 = arith.constant 0 : index
    %c0_28 = arith.constant 0 : index
    %68 = vector.load %arg2[%c6, %c0_27, %c0_28] : memref<9x4x1xf32, #tpu.memory_space<vmem>>, vector<1x4x1xf32>
    %69 = vector.shape_cast %68 : vector<1x4x1xf32> to vector<4x1xf32>
    %c6_29 = arith.constant 6 : index
    %c0_30 = arith.constant 0 : index
    %70 = vector.load %arg5[%c6_29, %c0_30] : memref<9x256xf32, #tpu.memory_space<vmem>>, vector<1x256xf32>
    %71 = vector.broadcast %69 : vector<4x1xf32> to vector<4x256xf32>
    %72 = vector.broadcast %70 : vector<1x256xf32> to vector<4x256xf32>
    %73 = arith.mulf %71, %72 : vector<4x256xf32>
    %74 = vector.shape_cast %73 : vector<4x256xf32> to vector<1x4x256xf32>
    %75 = vector.broadcast %74 : vector<1x4x256xf32> to vector<2x4x256xf32>
    %76 = arith.mulf %67, %75 : vector<2x4x256xf32>
    %77 = arith.addf %66, %76 : vector<2x4x256xf32>
    %c240_i32 = arith.constant 240 : i32
    %78 = tpu.dynamic_rotate %0 by %c240_i32 dim 2 : vector<2x4x256xf32>, i32 -> vector<2x4x256xf32>
    %c7 = arith.constant 7 : index
    %c0_31 = arith.constant 0 : index
    %c0_32 = arith.constant 0 : index
    %79 = vector.load %arg2[%c7, %c0_31, %c0_32] : memref<9x4x1xf32, #tpu.memory_space<vmem>>, vector<1x4x1xf32>
    %80 = vector.shape_cast %79 : vector<1x4x1xf32> to vector<4x1xf32>
    %c7_33 = arith.constant 7 : index
    %c0_34 = arith.constant 0 : index
    %81 = vector.load %arg5[%c7_33, %c0_34] : memref<9x256xf32, #tpu.memory_space<vmem>>, vector<1x256xf32>
    %82 = vector.broadcast %80 : vector<4x1xf32> to vector<4x256xf32>
    %83 = vector.broadcast %81 : vector<1x256xf32> to vector<4x256xf32>
    %84 = arith.mulf %82, %83 : vector<4x256xf32>
    %85 = vector.shape_cast %84 : vector<4x256xf32> to vector<1x4x256xf32>
    %86 = vector.broadcast %85 : vector<1x4x256xf32> to vector<2x4x256xf32>
    %87 = arith.mulf %78, %86 : vector<2x4x256xf32>
    %88 = arith.addf %77, %87 : vector<2x4x256xf32>
    %c239_i32 = arith.constant 239 : i32
    %89 = tpu.dynamic_rotate %0 by %c239_i32 dim 2 : vector<2x4x256xf32>, i32 -> vector<2x4x256xf32>
    %c8 = arith.constant 8 : index
    %c0_35 = arith.constant 0 : index
    %c0_36 = arith.constant 0 : index
    %90 = vector.load %arg2[%c8, %c0_35, %c0_36] : memref<9x4x1xf32, #tpu.memory_space<vmem>>, vector<1x4x1xf32>
    %91 = vector.shape_cast %90 : vector<1x4x1xf32> to vector<4x1xf32>
    %c8_37 = arith.constant 8 : index
    %c0_38 = arith.constant 0 : index
    %92 = vector.load %arg5[%c8_37, %c0_38] : memref<9x256xf32, #tpu.memory_space<vmem>>, vector<1x256xf32>
    %93 = vector.broadcast %91 : vector<4x1xf32> to vector<4x256xf32>
    %94 = vector.broadcast %92 : vector<1x256xf32> to vector<4x256xf32>
    %95 = arith.mulf %93, %94 : vector<4x256xf32>
    %96 = vector.shape_cast %95 : vector<4x256xf32> to vector<1x4x256xf32>
    %97 = vector.broadcast %96 : vector<1x4x256xf32> to vector<2x4x256xf32>
    %98 = arith.mulf %89, %97 : vector<2x4x256xf32>
    %99 = arith.addf %88, %98 : vector<2x4x256xf32>
    %cst_39 = arith.constant dense<0.000000e+00> : vector<4x256xf32>
    %100 = vector.multi_reduction <add>, %99, %cst_39 [0] : vector<2x4x256xf32> to vector<4x256xf32>
    %101 = vector.shape_cast %100 : vector<4x256xf32> to vector<1x4x256xf32>
    %cst_40 = arith.constant dense<0.000000e+00> : vector<1x4xf32>
    %102 = vector.multi_reduction <add>, %101, %cst_40 [2] : vector<1x4x256xf32> to vector<1x4xf32>
    %103 = vector.shape_cast %102 : vector<1x4xf32> to vector<1x4x1xf32>
    %104 = arith.mulf %99, %99 : vector<2x4x256xf32>
    %cst_41 = arith.constant dense<0.000000e+00> : vector<4x256xf32>
    %105 = vector.multi_reduction <add>, %104, %cst_41 [0] : vector<2x4x256xf32> to vector<4x256xf32>
    %106 = vector.shape_cast %105 : vector<4x256xf32> to vector<1x4x256xf32>
    %cst_42 = arith.constant dense<0.000000e+00> : vector<1x4xf32>
    %107 = vector.multi_reduction <add>, %106, %cst_42 [2] : vector<1x4x256xf32> to vector<1x4xf32>
    %108 = vector.shape_cast %107 : vector<1x4xf32> to vector<1x4x1xf32>
    %cst_43 = arith.constant 0.001953125 : f32
    %109 = vector.broadcast %cst_43 : f32 to vector<1x4x1xf32>
    %110 = arith.mulf %103, %109 : vector<1x4x1xf32>
    %cst_44 = arith.constant 0.001953125 : f32
    %111 = vector.broadcast %cst_44 : f32 to vector<1x4x1xf32>
    %112 = arith.mulf %108, %111 : vector<1x4x1xf32>
    %113 = arith.mulf %110, %110 : vector<1x4x1xf32>
    %114 = arith.subf %112, %113 : vector<1x4x1xf32>
    %cst_45 = arith.constant 0.000000e+00 : f32
    %115 = vector.broadcast %cst_45 : f32 to vector<1x4x1xf32>
    %116 = arith.maximumf %114, %115 : vector<1x4x1xf32>
    %cst_46 = arith.constant 9.99999974E-6 : f32
    %117 = vector.broadcast %cst_46 : f32 to vector<1x4x1xf32>
    %118 = arith.addf %116, %117 : vector<1x4x1xf32>
    %119 = math.rsqrt %118 : vector<1x4x1xf32>
    %c0_47 = arith.constant 0 : index
    %c0_48 = arith.constant 0 : index
    %c0_49 = arith.constant 0 : index
    %120 = vector.load %arg3[%c0_47, %c0_48, %c0_49] : memref<1x4x1xf32, #tpu.memory_space<vmem>>, vector<1x4x1xf32>
    %121 = arith.mulf %119, %120 : vector<1x4x1xf32>
    %c0_50 = arith.constant 0 : index
    %c0_51 = arith.constant 0 : index
    %c0_52 = arith.constant 0 : index
    %122 = vector.load %arg4[%c0_50, %c0_51, %c0_52] : memref<1x4x1xf32, #tpu.memory_space<vmem>>, vector<1x4x1xf32>
    %123 = arith.mulf %110, %121 : vector<1x4x1xf32>
    %124 = arith.subf %122, %123 : vector<1x4x1xf32>
    %125 = vector.broadcast %121 : vector<1x4x1xf32> to vector<2x4x256xf32>
    %126 = arith.mulf %99, %125 : vector<2x4x256xf32>
    %127 = vector.broadcast %124 : vector<1x4x1xf32> to vector<2x4x256xf32>
    %128 = arith.addf %126, %127 : vector<2x4x256xf32>
    %129 = arith.maximumf %0, %128 : vector<2x4x256xf32>
    %c0_53 = arith.constant 0 : index
    %c0_54 = arith.constant 0 : index
    %c0_55 = arith.constant 0 : index
    %130 = vector.load %arg6[%c0_53, %c0_54, %c0_55] : memref<2x4x256xf32, #tpu.memory_space<vmem>>, vector<2x4x256xf32>
    tpu.vector_store %arg6[%c0_53, %c0_54, %c0_55], %129 {strides = array<i32>} : memref<2x4x256xf32, #tpu.memory_space<vmem>>, vector<2x4x256xf32>,
    return
  }
  func.func @transform_0(%arg0: i32) -> (i32, i32, i32) {
    %c0_i32 = arith.constant 0 : i32
    %c0_i32_0 = arith.constant 0 : i32
    %c0_i32_1 = arith.constant 0 : i32
    return %c0_i32, %arg0, %c0_i32_0 : i32, i32, i32
  }
  func.func @transform_1(%arg0: i32) -> (i32, i32, i32) {
    %c0_i32 = arith.constant 0 : i32
    %c0_i32_0 = arith.constant 0 : i32
    %c0_i32_1 = arith.constant 0 : i32
    return %c0_i32, %arg0, %c0_i32_0 : i32, i32, i32
  }
  func.func @transform_2(%arg0: i32) -> (i32, i32, i32) {
    %c0_i32 = arith.constant 0 : i32
    %c0_i32_0 = arith.constant 0 : i32
    %c0_i32_1 = arith.constant 0 : i32
    return %c0_i32, %arg0, %c0_i32_0 : i32, i32, i32
  }
  func.func @transform_3(%arg0: i32) -> (i32, i32, i32) {
    %c0_i32 = arith.constant 0 : i32
    %c0_i32_0 = arith.constant 0 : i32
    %c0_i32_1 = arith.constant 0 : i32
    return %c0_i32, %arg0, %c0_i32_0 : i32, i32, i32
  }
  func.func @transform_4(%arg0: i32) -> (i32, i32) {
    %c0_i32 = arith.constant 0 : i32
    %c0_i32_0 = arith.constant 0 : i32
    %c0_i32_1 = arith.constant 0 : i32
    return %c0_i32, %c0_i32_0 : i32, i32
  }
  func.func @transform_5(%arg0: i32) -> (i32, i32, i32) {
    %c0_i32 = arith.constant 0 : i32
    %c0_i32_0 = arith.constant 0 : i32
    %c0_i32_1 = arith.constant 0 : i32
    return %c0_i32, %arg0, %c0_i32_0 : i32, i32, i32
  }
}

</mosaic_0001>

<bundles_post_ra>
// kernel: tpu_custom_call.1
= control target key start
LH: loop header
LB: loop body
LE: loop exit
PB: predicated region body
PF: predicated region fallthrough
CT: control target
= control target key end

     0   :  { %v554_v2 = vmov 0   ;;  %s963_s0 = inlined_call_operand.vmem [shape: f32[2,4,256], index: 0, kind: input, shape index: {}]   ;;  %s964_s1 = inlined_call_operand.vmem [shape: f32[9,4,1], index: 1, kind: input, shape index: {}]   ;;  %s965_s2 = inlined_call_operand.vmem [shape: f32[1,4,1], index: 2, kind: input, shape index: {}]   ;;  %s966_s3 = inlined_call_operand.vmem [shape: f32[1,4,1], index: 3, kind: input, shape index: {}]   ;;  %s967_s4 = inlined_call_operand.vmem [shape: f32[9,256], index: 4, kind: input, shape index: {}]   ;;  %s968_s5 = inlined_call_operand.hbm [shape: f32[2,4,256], index: 5, kind: output, shape index: {}]  }
   0x1   :  { %v498_v0 = vld [vmem:[%s964_s1 + $0x8] sm:$0xf]  ;;  %v44_v1 = vld [vmem:[%s964_s1] sm:$0xf]  ;;  %525 = vset.pattern.permute.xlu1 %v554_v2  ;;  %524 = vset.pattern.permute.xlu0 %v554_v2  ;;  %v502_v3 = vld [vmem:[%s964_s1 + $0x10] sm:$0xf] }
   0x2   :  { %134 = vperm.xlu1 %525, %v498_v0   ;;  %48 = vperm.xlu0 %524, %v44_v1   ;;  %v496_v4 = vld [vmem:[%s964_s1 + $0x4] sm:$0xf]  ;;  %v500_v5 = vld [vmem:[%s964_s1 + $0xc] sm:$0xf] }
   0x3   :  { %v614_v6 = vld [vmem:[%s963_s0] sm:$0xff] }
   0x6   :  { %207 = vperm.xlu1 %525, %v502_v3   ;;  %91 = vperm.xlu0 %524, %v496_v4  }
   0x7   :  { %10 = vsyncpa [#allocation3], 0  ;;  %s555_s30 = smov 17   ;;  %v25_v7 = vcombine.high %v614_v6, %v614_v6  ;;  %v622_v8 = vld [vmem:[%s963_s0 + $0x8] sm:$0xff]  ;;  %s556_s8 = smov 16   ;;  %v37_v32 = vlaneseq  ;;  %vm411_vm8 = vcmask 1043456  }
   0x8   :  { %v26_v9 = vcombine.high %v622_v8, %v622_v8  ;;  %v504_v10 = vld [vmem:[%s964_s1 + $0x14] sm:$0xf]  ;;  %s557_s0 = smov 15   ;;  %v506_v11 = vld [vmem:[%s964_s1 + $0x18] sm:$0xf]  ;;  %s558_s13 = smov 1  }
   0x9   :  { %v508_v12 = vld [vmem:[%s964_s1 + $0x1c] sm:$0xf]  ;;  %v510_v13 = vld [vmem:[%s964_s1 + $0x20] sm:$0xf]  ;;  %s559_s18 = smov 127   ;;  %s560_s19 = smov 113  }
   0xa   :  { %177 = vperm.xlu0 %524, %v500_v5   ;;  %29 = vrot.lane.b32.xlu1 %v614_v6, %s555_s30  ;;  %s561_s20 = smov 112   ;;  %s562_s1 = smov 111   ;;  %v53_v35 = vshrl.u32 %v37_v32, 7  ;;  %v499_v40 = vld [vmem:[%s967_s4 + $0x2] ss:$8 sm:$0x3] }
   0xb   :  { %v45_v41 = vld [vmem:[%s967_s4] ss:$8 sm:$0x3]  ;;  %v503_v42 = vld [vmem:[%s967_s4 + $0x4] ss:$8 sm:$0x3] }
   0xc   :  { %v695_v38 = vsub.s32 0, %v53_v35  ;;  %v697_v39 = vsub.s32 1, %v53_v35  ;;  %v497_v43 = vld [vmem:[%s967_s4 + $0x1] ss:$8 sm:$0x3]  ;;  %v718_v47 = vand.u32 127, %v37_v32 }
   0xd   :  { %v501_v46 = vld [vmem:[%s967_s4 + $0x3] ss:$8 sm:$0x3]  ;;  %v724_v49 = vld [vmem:[%s967_s4 + $0x5] ss:$8 sm:$0x3] }
   0xe   :  { %31 = vrot.lane.b32.xlu0 %v622_v8, %s555_s30  ;;  %33 = vrot.lane.b32.xlu1 %v25_v7, %s555_s30  ;;  %v141_v48 = vrot.slane %v499_v40, %v695_v38  ;;  %v145_v50 = vrot.slane %v499_v40, %v697_v39  ;;  %v55_v51 = vrot.slane %v45_v41, %v695_v38  ;;  %v733_v54 = vld [vmem:[%s967_s4 + $0x6] ss:$8 sm:$0x3]  ;;  %v742_v59 = vld [vmem:[%s967_s4 + $0x7] ss:$8 sm:$0x3] }
   0xf   :  { %v214_v52 = vrot.slane %v503_v42, %v695_v38  ;;  %v218_v53 = vrot.slane %v503_v42, %v697_v39  ;;  %v59_v55 = vrot.slane %v45_v41, %v697_v39  ;;  %v98_v56 = vrot.slane %v497_v43, %v695_v38  ;;  %v756_v0 = vld [vmem:[%s967_s4 + $0x10] ss:$8 sm:$0x3] }
  0x10   :  { %v102_v57 = vrot.slane %v497_v43, %v697_v39  ;;  %v184_v58 = vrot.slane %v501_v46, %v695_v38  ;;  %v188_v62 = vrot.slane %v501_v46, %v697_v39  ;;  %vm39_vm0 = vcmp.lt.s32.totalorder %v718_v47, 17 }
  0x11   :  { %vm80_vm1 = vcmp.lt.s32.totalorder %v718_v47, 16  ;;  %v265_v63 = vrot.slane %v724_v49, %v695_v38  ;;  %v269_v1 = vrot.slane %v724_v49, %v697_v39  ;;  %vm123_vm2 = vcmp.lt.s32.totalorder %v718_v47, 15 }
  0x12   :  { %35 = vrot.lane.b32.xlu0 %v26_v9, %s555_s30  ;;  %72 = vrot.lane.b32.xlu1 %v614_v6, %s556_s8  ;;  %v308_v2 = vrot.slane %v733_v54, %v695_v38  ;;  %v312_v3 = vrot.slane %v733_v54, %v697_v39  ;;  %vm166_vm3 = vcmp.lt.s32.totalorder %v718_v47, 1  ;;  %vm247_vm4 = vcmp.lt.s32.totalorder %v718_v47, 127 }
  0x13   :  { %vm290_vm5 = vcmp.lt.s32.totalorder %v718_v47, 113  ;;  %vm333_vm6 = vcmp.lt.s32.totalorder %v718_v47, 112  ;;  %vm376_vm7 = vcmp.lt.s32.totalorder %v718_v47, 111 }
  0x16   :  { %74 = vrot.lane.b32.xlu0 %v622_v8, %s556_s8  ;;  %76 = vrot.lane.b32.xlu1 %v25_v7, %s556_s8 }
  0x1a   :  { %78 = vrot.lane.b32.xlu0 %v26_v9, %s556_s8  ;;  %258 = vperm.xlu1 %525, %v504_v10  }
  0x1e   :  { %115 = vrot.lane.b32.xlu0 %v614_v6, %s557_s0  ;;  %117 = vrot.lane.b32.xlu1 %v622_v8, %s557_s0 }
  0x22   :  { %119 = vrot.lane.b32.xlu0 %v25_v7, %s557_s0  ;;  %121 = vrot.lane.b32.xlu1 %v26_v9, %s557_s0 }
  0x26   :  { %301 = vperm.xlu0 %524, %v506_v11   ;;  %158 = vrot.lane.b32.xlu1 %v614_v6, %s558_s13 }
  0x2a   :  { %160 = vrot.lane.b32.xlu0 %v622_v8, %s558_s13  ;;  %162 = vrot.lane.b32.xlu1 %v25_v7, %s558_s13 }
  0x2e   :  { %164 = vrot.lane.b32.xlu0 %v26_v9, %s558_s13  ;;  %344 = vperm.xlu1 %525, %v508_v12  }
  0x32   :  { %387 = vperm.xlu0 %524, %v510_v13   ;;  %239 = vrot.lane.b32.xlu1 %v614_v6, %s559_s18 }
  0x36   :  { %241 = vrot.lane.b32.xlu0 %v622_v8, %s559_s18  ;;  %243 = vrot.lane.b32.xlu1 %v25_v7, %s559_s18 }
  0x3a   :  { %245 = vrot.lane.b32.xlu0 %v26_v9, %s559_s18  ;;  %282 = vrot.lane.b32.xlu1 %v614_v6, %s560_s19 }
  0x3e   :  { %284 = vrot.lane.b32.xlu0 %v622_v8, %s560_s19  ;;  %286 = vrot.lane.b32.xlu1 %v25_v7, %s560_s19 }
  0x42   :  { %288 = vrot.lane.b32.xlu0 %v26_v9, %s560_s19  ;;  %325 = vrot.lane.b32.xlu1 %v614_v6, %s561_s20 }
  0x46   :  { %327 = vrot.lane.b32.xlu0 %v622_v8, %s561_s20  ;;  %329 = vrot.lane.b32.xlu1 %v25_v7, %s561_s20 }
  0x4a   :  { %331 = vrot.lane.b32.xlu0 %v26_v9, %s561_s20  ;;  %368 = vrot.lane.b32.xlu1 %v614_v6, %s562_s1 }
  0x4e   :  { %370 = vrot.lane.b32.xlu0 %v622_v8, %s562_s1  ;;  %372 = vrot.lane.b32.xlu1 %v25_v7, %s562_s1  ;;  %v351_v7 = vrot.slane %v742_v59, %v695_v38 }
  0x52   :  { %374 = vrot.lane.b32.xlu0 %v26_v9, %s562_s1 }
  0x81   :  { %v653_v14 = vpop.permute.xlu1 %134  ;;  %v655_v15 = vpop.permute.xlu0 %48 }
  0x82   :  { %v148_v9 = vmul.f32 %v141_v48, %v653_v14  ;;  %v62_v35 = vmul.f32 %v55_v51, %v655_v15  ;;  %v63_v42 = vmul.f32 %v59_v55, %v655_v15 }
  0x85   :  { %v208_v16 = vpop.permute.xlu1 %207  ;;  %v657_v17 = vpop.permute.xlu0 %91 }
  0x86   :  { %v221_v4 = vmul.f32 %v214_v52, %v208_v16  ;;  %v222_v5 = vmul.f32 %v218_v53, %v208_v16  ;;  %v149_v16 = vmul.f32 %v145_v50, %v653_v14  ;;  %v105_v43 = vmul.f32 %v98_v56, %v657_v17 }
  0x87   :  { %v106_v50 = vmul.f32 %v102_v57, %v657_v17 }
  0x88   :  { %v225_v48 = vcombine.low %v221_v4, %v222_v5 }
  0x89   :  { %v659_v18 = vpop.permute.xlu0 %177  ;;  %v661_v19 = vpop.permute.xlu1 %29 }
  0x8a   :  { %v192_v15 = vmul.f32 %v188_v62, %v659_v18  ;;  %v847_v4 = vmul.f32 %v225_v48, %v622_v8 }
  0x8d   :  { %v663_v20 = vpop.permute.xlu0 %31  ;;  %v665_v21 = vpop.permute.xlu1 %33 }
  0x8e   :  { %v40_v40 = vsel %vm39_vm0, %v661_v19, %v665_v21  ;;  %v42_v41 = vsel %vm39_vm0, %v665_v21, %v661_v19  ;;  %v191_v19 = vmul.f32 %v184_v58, %v659_v18 }
  0x8f   :  { %v64_v21 = vmul.f32 %v62_v35, %v42_v41  ;;  %v65_v51 = vmul.f32 %v63_v42, %v40_v40 }
  0x91   :  { %v667_v22 = vpop.permute.xlu0 %35  ;;  %v669_v23 = vpop.permute.xlu1 %72 }
  0x95   :  { %v671_v24 = vpop.permute.xlu0 %74  ;;  %v673_v25 = vpop.permute.xlu1 %76 }
  0x96   :  { %v81_v14 = vsel %vm80_vm1, %v669_v23, %v673_v25  ;;  %v83_v46 = vsel %vm80_vm1, %v673_v25, %v669_v23 }
  0x97   :  { %v107_v17 = vmul.f32 %v105_v43, %v83_v46  ;;  %v108_v55 = vmul.f32 %v106_v50, %v81_v14 }
  0x99   :  { %v675_v26 = vpop.permute.xlu0 %78  ;;  %v677_v27 = vpop.permute.xlu1 %258  ;;  %v111_v41 = vadd.f32 %v107_v17, %v64_v21  ;;  %v112_v14 = vadd.f32 %v108_v55, %v65_v51  ;;  %v232_v21 = vcombine.high %v847_v4, %v847_v4 }
  0x9a   :  { %v82_v18 = vsel %vm80_vm1, %v671_v24, %v675_v26  ;;  %v84_v56 = vsel %vm80_vm1, %v675_v26, %v671_v24 }
  0x9d   :  { %v679_v28 = vpop.permute.xlu0 %115  ;;  %v681_v29 = vpop.permute.xlu1 %117 }
  0xa1   :  { %v683_v30 = vpop.permute.xlu0 %119  ;;  %v685_v31 = vpop.permute.xlu1 %121 }
  0xa2   :  { %v124_v52 = vsel %vm123_vm2, %v679_v28, %v683_v30  ;;  %v126_v23 = vsel %vm123_vm2, %v683_v30, %v679_v28  ;;  %v41_v28 = vsel %vm39_vm0, %v663_v20, %v667_v22  ;;  %v43_v30 = vsel %vm39_vm0, %v667_v22, %v663_v20 }
  0xa3   :  { %v150_v26 = vmul.f32 %v148_v9, %v126_v23  ;;  %v151_v58 = vmul.f32 %v149_v16, %v124_v52  ;;  %v125_v62 = vsel %vm123_vm2, %v681_v29, %v685_v31  ;;  %v127_v20 = vsel %vm123_vm2, %v685_v31, %v681_v29 }
  0xa4   :  { %v227_v22 = vmul.f32 %v225_v48, %v614_v6  ;;  %v66_v23 = vmul.f32 %v62_v35, %v43_v30  ;;  %v67_v12 = vmul.f32 %v63_v42, %v41_v28  ;;  %v152_v11 = vmul.f32 %v148_v9, %v127_v20 }
  0xa5   :  { %v687_v33 = vpop.permute.xlu0 %301  ;;  %v689_v34 = vpop.permute.xlu1 %158  ;;  %v153_v10 = vmul.f32 %v149_v16, %v125_v62  ;;  %v154_v29 = vadd.f32 %v150_v26, %v111_v41  ;;  %v155_v31 = vadd.f32 %v151_v58, %v112_v14  ;;  %v969_v26 = vrot.slane %v742_v59, %v697_v39 }
  0xa9   :  { %v691_v36 = vpop.permute.xlu0 %160  ;;  %v693_v37 = vpop.permute.xlu1 %162 }
  0xaa   :  { %v167_v57 = vsel %vm166_vm3, %v689_v34, %v693_v37  ;;  %v169_v24 = vsel %vm166_vm3, %v693_v37, %v689_v34  ;;  %v109_v34 = vmul.f32 %v105_v43, %v84_v56  ;;  %v110_v37 = vmul.f32 %v106_v50, %v82_v18 }
  0xab   :  { %v193_v46 = vmul.f32 %v191_v19, %v169_v24  ;;  %v194_v52 = vmul.f32 %v192_v15, %v167_v57  ;;  %v231_v50 = vcombine.high %v227_v22, %v227_v22 }
  0xac   :  { %v113_v35 = vadd.f32 %v109_v34, %v66_v23  ;;  %v114_v42 = vadd.f32 %v110_v37, %v67_v12 }
  0xad   :  { %v711_v44 = vpop.permute.xlu0 %164  ;;  %v713_v45 = vpop.permute.xlu1 %344  ;;  %v197_v51 = vadd.f32 %v193_v46, %v154_v29  ;;  %v198_v17 = vadd.f32 %v194_v52, %v155_v31  ;;  %v971_v52 = vrot.slane %v756_v0, %v697_v39 }
  0xae   :  { %v168_v48 = vsel %vm166_vm3, %v691_v36, %v711_v44  ;;  %v170_v43 = vsel %vm166_vm3, %v711_v44, %v691_v36  ;;  %v272_v36 = vmul.f32 %v265_v63, %v677_v27  ;;  %v273_v44 = vmul.f32 %v269_v1, %v677_v27 }
  0xaf   :  { %v195_v12 = vmul.f32 %v191_v19, %v170_v43  ;;  %v196_v56 = vmul.f32 %v192_v15, %v168_v48  ;;  %v156_v28 = vadd.f32 %v152_v11, %v113_v35  ;;  %v157_v30 = vadd.f32 %v153_v10, %v114_v42 }
  0xb0   :  { %v316_v63 = vmul.f32 %v312_v3, %v687_v33  ;;  %v235_v11 = vadd.f32 %v227_v22, %v197_v51  ;;  %v236_v19 = vadd.f32 %v231_v50, %v198_v17  ;;  %v358_v24 = vmul.f32 %v351_v7, %v713_v45 }
  0xb1   :  { %v744_v60 = vpop.permute.xlu0 %387  ;;  %v746_v61 = vpop.permute.xlu1 %239  ;;  %v199_v54 = vadd.f32 %v195_v12, %v156_v28  ;;  %v200_v3 = vadd.f32 %v196_v56, %v157_v30  ;;  %v359_v58 = vmul.f32 %v969_v26, %v713_v45  ;;  %v970_v45 = vrot.slane %v756_v0, %v695_v38 }
  0xb2   :  { %v402_v23 = vmul.f32 %v971_v52, %v744_v60 }
  0xb3   :  { %v401_v59 = vmul.f32 %v970_v45, %v744_v60  ;;  %v237_v29 = vadd.f32 %v847_v4, %v199_v54  ;;  %v238_v31 = vadd.f32 %v232_v21, %v200_v3 }
  0xb5   :  { %v775_v13 = vpop.permute.xlu0 %241  ;;  %v244_v32 = vpop.permute.xlu1 %243 }
  0xb6   :  { %v248_v55 = vsel %vm247_vm4, %v746_v61, %v244_v32  ;;  %v250_v18 = vsel %vm247_vm4, %v244_v32, %v746_v61  ;;  %v315_v61 = vmul.f32 %v308_v2, %v687_v33 }
  0xb7   :  { %v274_v32 = vmul.f32 %v272_v36, %v248_v55  ;;  %v275_v57 = vmul.f32 %v273_v44, %v250_v18 }
  0xb9   :  { %v809_v25 = vpop.permute.xlu0 %245  ;;  %v283_v53 = vpop.permute.xlu1 %282  ;;  %v279_v20 = vadd.f32 %v275_v57, %v236_v19 }
  0xba   :  { %v249_v2 = vsel %vm247_vm4, %v775_v13, %v809_v25  ;;  %v251_v33 = vsel %vm247_vm4, %v809_v25, %v775_v13  ;;  %v278_v25 = vadd.f32 %v274_v32, %v235_v11 }
  0xbb   :  { %v276_v22 = vmul.f32 %v272_v36, %v249_v2  ;;  %v277_v34 = vmul.f32 %v273_v44, %v251_v33 }
  0xbd   :  { %v285_v5 = vpop.permute.xlu0 %284  ;;  %v287_v40 = vpop.permute.xlu1 %286  ;;  %v280_v35 = vadd.f32 %v276_v22, %v237_v29  ;;  %v281_v42 = vadd.f32 %v277_v34, %v238_v31  ;;  %v445_v31 = vld [vmem:[%s965_s2] sm:$0xf]  ;;  %s563_s2 = smov [#allocation2]  }
  0xbe   :  { %v291_v27 = vsel %vm290_vm5, %v283_v53, %v287_v40  ;;  %v293_v49 = vsel %vm290_vm5, %v287_v40, %v283_v53  ;;  %s485_s16 = sshll.u32 %s563_s2, 4  ;;  %s486_s16 = int_to_ptr.vmem [resolvable:$true] %s485_s16 }
  0xbf   :  { %v317_v62 = vmul.f32 %v315_v61, %v291_v27  ;;  %v318_v13 = vmul.f32 %v316_v63, %v293_v49  ;;  %p535_p1 = scmp.lt.s32.totalorder %s486_s16, %s486_s16 }
  0xc1   :  { %v289_v9 = vpop.permute.xlu0 %288  ;;  %v326_v16 = vpop.permute.xlu1 %325  ;;  %v321_v48 = vadd.f32 %v317_v62, %v278_v25  ;;  %v322_v43 = vadd.f32 %v318_v13, %v279_v20 }
  0xc2   :  { %v292_v41 = vsel %vm290_vm5, %v285_v5, %v289_v9  ;;  %v294_v14 = vsel %vm290_vm5, %v289_v9, %v285_v5 }
  0xc3   :  { %v319_v38 = vmul.f32 %v315_v61, %v292_v41  ;;  %v320_v9 = vmul.f32 %v316_v63, %v294_v14 }
  0xc5   :  { %v328_v1 = vpop.permute.xlu0 %327  ;;  %v330_v10 = vpop.permute.xlu1 %329  ;;  %v323_v36 = vadd.f32 %v319_v38, %v280_v35  ;;  %v324_v44 = vadd.f32 %v320_v9, %v281_v42 }
  0xc6   :  { %v334_v15 = vsel %vm333_vm6, %v326_v16, %v330_v10  ;;  %v336_v53 = vsel %vm333_vm6, %v330_v10, %v326_v16 }
  0xc7   :  { %v360_v7 = vmul.f32 %v358_v24, %v334_v15  ;;  %v361_v46 = vmul.f32 %v359_v58, %v336_v53 }
  0xc9   :  { %v332_v37 = vpop.permute.xlu0 %331  ;;  %v369_v40 = vpop.permute.xlu1 %368  ;;  %v364_v17 = vadd.f32 %v360_v7, %v321_v48  ;;  %v365_v39 = vadd.f32 %v361_v46, %v322_v43 }
  0xca   :  { %v335_v5 = vsel %vm333_vm6, %v328_v1, %v332_v37  ;;  %v337_v50 = vsel %vm333_vm6, %v332_v37, %v328_v1 }
  0xcb   :  { %v362_v4 = vmul.f32 %v358_v24, %v335_v5  ;;  %v363_v21 = vmul.f32 %v359_v58, %v337_v50  ;;  %v447_v5 = vld [vmem:[%s966_s3] sm:$0xf]  ;;  %s530_s3 = scalar_lea.vmem %s486_s16, 256 }
  0xcc   :  { %p531_p0 = scmp.ne.s32.totalorder %s486_s16, %s530_s3  ;;  %p536_p2 = scmp.lt.s32.totalorder %s530_s3, %s530_s3 }
  0xcd   :  { %v371_v16 = vpop.permute.xlu0 %370  ;;  %v373_v51 = vpop.permute.xlu1 %372  ;;  %v366_v63 = vadd.f32 %v362_v4, %v323_v36  ;;  %v367_v32 = vadd.f32 %v363_v21, %v324_v44 }
  0xce   :  { %v377_v60 = vsel %vm376_vm7, %v369_v40, %v373_v51  ;;  %v379_v0 = vsel %vm376_vm7, %v373_v51, %v369_v40  ;;  %p537_p3 = por %p536_p2, %p535_p1 }
  0xcf   :  { %v403_v55 = vmul.f32 %v401_v59, %v377_v60  ;;  %v404_v18 = vmul.f32 %v402_v23, %v379_v0 }
  0xd0   :  { %p538_p4 = pnand %p537_p3, %p531_p0 }
  0xd1   :  { %v407_v12 = vadd.f32 %v403_v55, %v364_v17  ;;  %v408_v56 = vadd.f32 %v404_v18, %v365_v39  ;;  %v375_v28 = vpop.permute.xlu0 %374 }
  0xd2   :  { %v378_v30 = vsel %vm376_vm7, %v371_v16, %v375_v28  ;;  %v380_v61 = vsel %vm376_vm7, %v375_v28, %v371_v16 }
  0xd3   :  { %v405_v57 = vmul.f32 %v401_v59, %v378_v30  ;;  %v406_v27 = vmul.f32 %v402_v23, %v380_v61  ;;  %v423_v10 = vmul.f32 %v407_v12, %v407_v12  ;;  %v424_v11 = vmul.f32 %v408_v56, %v408_v56 }
  0xd4   :  { %v412_v19 = vsel %vm411_vm8, %v407_v12, 0.0  ;;  %v415_v2 = vsel %vm411_vm8, %v408_v56, 0.0 }
  0xd5   :  { %v409_v49 = vadd.f32 %v405_v57, %v366_v63  ;;  %v410_v1 = vadd.f32 %v406_v27, %v367_v32  ;;  %v427_v24 = vsel %vm411_vm8, %v423_v10, 0.0  ;;  %v430_v58 = vsel %vm411_vm8, %v424_v11, 0.0 }
  0xd7   :  { %v413_v33 = vsel %vm411_vm8, %v409_v49, 0.0  ;;  %v416_v54 = vsel %vm411_vm8, %v410_v1, 0.0  ;;  %v425_v3 = vmul.f32 %v409_v49, %v409_v49  ;;  %v426_v47 = vmul.f32 %v410_v1, %v410_v1 }
  0xd8   :  { %v414_v15 = vadd.f32 %v413_v33, %v412_v19  ;;  %v417_v53 = vadd.f32 %v416_v54, %v415_v2 }
  0xd9   :  { %v428_v26 = vsel %vm411_vm8, %v425_v3, 0.0  ;;  %v431_v62 = vsel %vm411_vm8, %v426_v47, 0.0 }
  0xda   :  { %v418_v13 = vsel %vm411_vm8, %v414_v15, 0.0  ;;  %v419_v25 = vsel %vm411_vm8, %v417_v53, 0.0  ;;  %v429_v20 = vadd.f32 %v428_v26, %v427_v24  ;;  %v432_v22 = vadd.f32 %v431_v62, %v430_v58 }
  0xdb   :  { %v420_v34 = vadd.f32 %v419_v25, %v418_v13 }
  0xdc   :  { %v433_v37 = vsel %vm411_vm8, %v429_v20, 0.0  ;;  %v434_v40 = vsel %vm411_vm8, %v432_v22, 0.0 }
  0xdd   :  { %421 = vadd.xlane.f32.xlu1 %v420_v34  ;;  %v435_v41 = vadd.f32 %v434_v40, %v433_v37 }
  0xdf   :  { %436 = vadd.xlane.f32.xlu0 %v435_v41 }
 0x16a   :  { %v422_v14 = vpop.xlane.xlu1 %421 }
 0x16b   :  { %v438_v7 = vmul.f32 0.001953125, %v422_v14 }
 0x16c   :  { %v437_v46 = vpop.xlane.xlu0 %436 }
 0x16d   :  { %v440_v45 = vmul.f32 %v438_v7, %v438_v7  ;;  %v439_v59 = vmul.f32 0.001953125, %v437_v46 }
 0x16f   :  { %v441_v52 = vsub.f32 %v439_v59, %v440_v45 }
 0x171   :  { %v442_v23 = vmax.f32 %v441_v52, 0.0 }
 0x173   :  { %v443_v29 = vadd.f32 1e-05, %v442_v23 }
 0x175   :  { %528 = vrsqrt.f32 %v443_v29 }
 0x17f   :  { %v529_v48 = vpop.eup %528 }
 0x180   :  { %v446_v43 = vmul.f32 %v529_v48, %v445_v31 }
 0x182   :  { %452 = vperm.xlu0 %524, %v446_v43   ;;  %v448_v50 = vmul.f32 %v446_v43, %v438_v7 }
 0x184   :  { %v449_v35 = vsub.f32 %v447_v5, %v448_v50 }
 0x186   :  { %461 = vperm.xlu1 %525, %v449_v35  }
 0x201   :  { %v453_v42 = vpop.permute.xlu0 %452 }
 0x202   :  { %v455_v38 = vmul.f32 %v453_v42, %v407_v12  ;;  %v456_v9 = vmul.f32 %v453_v42, %v408_v56  ;;  %v457_v16 = vmul.f32 %v453_v42, %v409_v49  ;;  %v458_v51 = vmul.f32 %v453_v42, %v410_v1 }
 0x205   :  { %v462_v17 = vpop.permute.xlu1 %461 }
 0x206   :  { %v464_v39 = vadd.f32 %v462_v17, %v455_v38  ;;  %v465_v60 = vadd.f32 %v462_v17, %v456_v9  ;;  %v466_v0 = vadd.f32 %v462_v17, %v457_v16  ;;  %v467_v4 = vadd.f32 %v462_v17, %v458_v51 }
 0x208   :  { %v472_v21 = vcombine.low %v464_v39, %v465_v60  ;;  %v473_v55 = vcombine.low %v466_v0, %v467_v4 }
 0x20a   :  { %v476_v18 = vmax.f32 %v614_v6, %v472_v21  ;;  %v477_v36 = vmax.f32 %v622_v8, %v473_v55 }
 0x20c   :  { %478 = vst [vmem:[#allocation2] sm:$0xff] %v476_v18  ;;  %479 = vst [vmem:[#allocation2 + $0x8] sm:$0xff] %v477_v36 }
 0x20d   :  { %541 = shalt.err (!%p538_p4)
}
 0x20e   :  { %s542_s19 = scalar_lea.hbm %s968_s5, 256 }
 0x20f   :  { %p543_p5 = scmp.ne.s32.totalorder %s968_s5, %s542_s19  ;;  %p546_p6 = scmp.lt.u32.totalorder %s542_s19, %s968_s5 }
 0x211   :  { %p548_p7 = pnand %p546_p6, %p543_p5 }
 0x213   :  { %551 = shalt.err (!%p548_p7)
}
 0x214   :  { %s564_s23 = smov 128   ;;  %s565_s24 = smov 8  }
 0x215   :  { %491 = dma.vmem_to_hbm [thread:$0]  %s486_s16, 256, %s968_s5, [#allocation3], %s564_s23, %s564_s23, %s565_s24  }
 0x216   :  { %552 = dma.done.wait [#allocation3], 256  }
 0x217   :  { %553 = vsyncadd [#allocation3], 4294967040 }
 0x218   :  { %495 = vsyncpa [#allocation3], 1 }

</bundles_post_ra>
